<compile_context>
chip_gen: v7x
topology: tpu7x:2x2x1
jax: 0.10.0
libtpu: 0.0.40
codegen_flags: <defaults>
</compile_context>

<pallas_src>
import math

import jax
import jax.numpy as jnp
import numpy as np
from jax.experimental import pallas as pl
from jax.experimental.pallas import tpu as pltpu


def _round_up(x, m):
    return ((x + m - 1) // m) * m


def create_dct_matrix(N, dtype=jnp.float32):
    """DCT-II (orthonormal) matrix, mirrors the PyTorch reference construction."""
    n = jnp.arange(N, dtype=dtype)[None, :]
    k = jnp.arange(N, dtype=dtype)[:, None]
    dct = jnp.cos(jnp.pi * (2.0 * n + 1.0) * k / (2.0 * N))
    dct = dct.at[0].multiply(1.0 / math.sqrt(2.0))
    dct = dct * math.sqrt(2.0 / N)
    return dct


def fold_dct_weights(w_down, w_up, *, bottleneck_pad=128, dtype=jnp.float32):
    """Fold the DCT / IDCT matrices into the adapter weights.

    Call ONCE (module init / weight load), not per forward.  Entirely jnp,
    so it works under jit and with traced weights.

      A  = C^T @ W_down^T : (D, r) -> lane-padded   (D, Rp)
      Bm = W_up^T @ C     : (r, D) -> sublane-padded (Rp, D)

    Use dtype=jnp.bfloat16 on v5e to make the kernel's matmuls bf16-native
    (accuracy of the small adapter perturbation drops to ~1e-2 relative).
    """
    r, D = w_down.shape
    Rp = bottleneck_pad
    C = create_dct_matrix(D, dtype=jnp.float32)
    A = jnp.dot(C.T, w_down.T.astype(jnp.float32),
                precision=jax.lax.Precision.HIGHEST)          # (D, r)
    Bm = jnp.dot(w_up.T.astype(jnp.float32), C,
                 precision=jax.lax.Precision.HIGHEST)          # (r, D)
    A_p = jnp.zeros((D, Rp), dtype).at[:, :r].set(A.astype(dtype))
    Bm_p = jnp.zeros((Rp, D), dtype).at[:r, :].set(Bm.astype(dtype))
    return A_p, Bm_p


def _dct_adapter_kernel(x_ref, a_ref, b_ref, o_ref):
    # x_ref: (tm, D)   current tile of tokens
    # a_ref: (D, Rp)   folded down-projection  C^T @ W_down^T (lane-padded)
    # b_ref: (Rp, D)   folded up-projection    W_up^T @ C     (sublane-padded)
    x = x_ref[...]
    h = jnp.dot(x.astype(a_ref.dtype), a_ref[...],
                preferred_element_type=jnp.float32)
    h = jnp.where(h >= 0.0, h, 0.01 * h)          # F.leaky_relu default slope
    pert = jnp.dot(h.astype(b_ref.dtype), b_ref[...],
                   preferred_element_type=jnp.float32)
    o_ref[...] = (x.astype(jnp.float32) + pert).astype(o_ref.dtype)


def dct_adapter_forward(hidden_states, a_folded, b_folded, *, tm=1024):
    """hidden_states: (..., D).  a_folded: (D, Rp), b_folded: (Rp, D) from
    fold_dct_weights().  tm: row tile (1024 is a good default; 2048 on v7x)."""
    orig_shape = hidden_states.shape
    D = orig_shape[-1]
    assert D % 128 == 0, "feature dim must be lane-aligned (multiple of 128)"
    Rp = a_folded.shape[1]

    x = hidden_states.reshape(-1, D)
    M = x.shape[0]

    act_itemsize = jnp.dtype(hidden_states.dtype).itemsize
    w_itemsize = jnp.dtype(a_folded.dtype).itemsize

    # Dtype-aware sublane floor: 8 for fp32, 16 for bf16, 32 for int8/fp8.
    sub = max(8, 32 // max(1, act_itemsize))
    tm_eff = min(tm, _round_up(M, sub))
    tm_eff = max(sub, (tm_eff // sub) * sub)

    # Ragged grid: no host-side pad/slice; Pallas masks the last partial tile.
    grid = (pl.cdiv(M, tm_eff),)

    # VMEM: double-buffered x + out tiles, single-buffered weights, + slack.
    vmem_bytes = (4 * tm_eff * D * act_itemsize
                  + 2 * D * Rp * w_itemsize
                  + (4 << 20))
    vmem_limit = int(min(max(vmem_bytes, 32 << 20), 48 << 20))

    cost = pl.CostEstimate(
        flops=4 * M * D * Rp,
        transcendentals=0,
        bytes_accessed=2 * M * D * act_itemsize + 2 * D * Rp * w_itemsize,
    )

    out = pl.pallas_call(
        _dct_adapter_kernel,
        out_shape=jax.ShapeDtypeStruct((M, D), hidden_states.dtype),
        grid_spec=pltpu.PrefetchScalarGridSpec(
            num_scalar_prefetch=0,
            grid=grid,
            in_specs=[
                pl.BlockSpec((tm_eff, D), lambda i: (i, 0)),          # x tile
                pl.BlockSpec((D, Rp), lambda i: (0, 0),
                             pipeline_mode=pl.Buffered(1)),           # folded down
                pl.BlockSpec((Rp, D), lambda i: (0, 0),
                             pipeline_mode=pl.Buffered(1)),           # folded up
            ],
            out_specs=pl.BlockSpec((tm_eff, D), lambda i: (i, 0)),
        ),
        compiler_params=pltpu.CompilerParams(
            dimension_semantics=("parallel",),
            vmem_limit_bytes=vmem_limit,
        ),
        cost_estimate=cost,
    )(x, a_folded, b_folded)

    return out.reshape(orig_shape)


def dct_adapter_reference(hidden_states, w_down, w_up):
    """Pure-JAX reference mirroring the PyTorch forward (unfolded path)."""
    D = hidden_states.shape[-1]
    C = create_dct_matrix(D, dtype=jnp.float32)
    dct = hidden_states @ C.T
    z = dct.reshape(-1, D)
    h = z @ w_down.T
    h = jnp.where(h >= 0.0, h, 0.01 * h)
    z_pert = h @ w_up.T
    out = z_pert.reshape(dct.shape)
    idct = out @ C
    return hidden_states + idct


if __name__ == "__main__":
    # Small deterministic setup consistent with the module (in_features shrunk
    # 768 -> 128 to keep the example small; bottleneck stays 18).
    B, S, D = 2, 8, 128
    R = 18

    key = jax.random.PRNGKey(0)
    kx, kg, kd, ku = jax.random.split(key, 4)

    hidden_states = jax.random.normal(kx, (B, S, D), dtype=jnp.float32)
    adapter_gate_logits = jax.random.normal(kg, (D,), dtype=jnp.float32)  # unused in forward
    w_down = jax.random.normal(kd, (R, D), dtype=jnp.float32) * 0.02  # nn.Linear(D, 18).weight
    w_up = jax.random.normal(ku, (D, R), dtype=jnp.float32) * 0.02    # nn.Linear(18, D).weight

    # Fold once ("module init"), then reuse across forwards.
    A, Bm = fold_dct_weights(w_down, w_up)
    A, Bm = jax.block_until_ready((A, Bm))

    fwd = jax.jit(dct_adapter_forward)
    out = fwd(hidden_states, A, Bm)
    out = jax.block_until_ready(out)

    ref = dct_adapter_reference(hidden_states, w_down, w_up)
    np.testing.assert_allclose(np.asarray(out), np.asarray(ref), rtol=1e-4, atol=1e-4)

    print("KERNEL_OK")
</pallas_src>

<mosaic_0001>
module attributes {stable_mosaic.version = 11 : i64} {
  func.func @_dct_adapter_kernel(%arg0: i32, %arg1: memref<16x128xf32, #tpu.memory_space<vmem>>, %arg2: memref<128x128xf32, #tpu.memory_space<vmem>>, %arg3: memref<128x128xf32, #tpu.memory_space<vmem>>, %arg4: memref<16x128xf32, #tpu.memory_space<vmem>>) attributes {dimension_semantics = [#tpu.dimension_semantics<parallel>], iteration_bounds = array<i64: 1>, scalar_prefetch = 0 : i64, scratch_operands = 0 : i64, tpu.core_type = #tpu.core_type<tc>, window_params = [{transform_indices = @transform_0, window_bounds = array<i64: 16, 128>}, {pipeline_mode = #tpu.pipeline_mode<synchronous>, transform_indices = @transform_1, window_bounds = array<i64: 128, 128>}, {pipeline_mode = #tpu.pipeline_mode<synchronous>, transform_indices = @transform_2, window_bounds = array<i64: 128, 128>}, {transform_indices = @transform_3, window_bounds = array<i64: 16, 128>}]} {
    %c0 = arith.constant 0 : index
    %c0_0 = arith.constant 0 : index
    %0 = vector.load %arg1[%c0, %c0_0] : memref<16x128xf32, #tpu.memory_space<vmem>>, vector<16x128xf32>
    %c0_1 = arith.constant 0 : index
    %c0_2 = arith.constant 0 : index
    %1 = vector.load %arg2[%c0_1, %c0_2] : memref<128x128xf32, #tpu.memory_space<vmem>>, vector<128x128xf32>
    %cst = arith.constant dense<0.000000e+00> : vector<16x128xf32>
    %2 = tpu.matmul %0, %1, %cst {dimension_numbers = #tpu.dot_dimension_numbers<[1], [0], [0], [1], [0, 0, 1, 1], [], []>} : vector<16x128xf32>, vector<128x128xf32>, vector<16x128xf32> -> vector<16x128xf32>
    %cst_3 = arith.constant 0.000000e+00 : f32
    %3 = vector.broadcast %cst_3 : f32 to vector<16x128xf32>
    %4 = arith.cmpf oge, %2, %3 : vector<16x128xf32>
    %cst_4 = arith.constant 0.00999999977 : f32
    %5 = vector.broadcast %cst_4 : f32 to vector<16x128xf32>
    %6 = arith.mulf %5, %2 : vector<16x128xf32>
    %7 = arith.select %4, %2, %6 : vector<16x128xi1>, vector<16x128xf32>
    %c0_5 = arith.constant 0 : index
    %c0_6 = arith.constant 0 : index
    %8 = vector.load %arg3[%c0_5, %c0_6] : memref<128x128xf32, #tpu.memory_space<vmem>>, vector<128x128xf32>
    %cst_7 = arith.constant dense<0.000000e+00> : vector<16x128xf32>
    %9 = tpu.matmul %7, %8, %cst_7 {dimension_numbers = #tpu.dot_dimension_numbers<[1], [0], [0], [1], [0, 0, 1, 1], [], []>} : vector<16x128xf32>, vector<128x128xf32>, vector<16x128xf32> -> vector<16x128xf32>
    %10 = arith.addf %0, %9 : vector<16x128xf32>
    %c0_8 = arith.constant 0 : index
    %c0_9 = arith.constant 0 : index
    %11 = vector.load %arg4[%c0_8, %c0_9] : memref<16x128xf32, #tpu.memory_space<vmem>>, vector<16x128xf32>
    tpu.vector_store %arg4[%c0_8, %c0_9], %10 {strides = array<i32>} : memref<16x128xf32, #tpu.memory_space<vmem>>, vector<16x128xf32>,
    return
  }
  func.func @transform_0(%arg0: i32) -> (i32, i32) {
    %c0_i32 = arith.constant 0 : i32
    %c0_i32_0 = arith.constant 0 : i32
    return %arg0, %c0_i32 : i32, i32
  }
  func.func @transform_1(%arg0: i32) -> (i32, i32) {
    %c0_i32 = arith.constant 0 : i32
    %c0_i32_0 = arith.constant 0 : i32
    %c0_i32_1 = arith.constant 0 : i32
    return %c0_i32, %c0_i32_0 : i32, i32
  }
  func.func @transform_2(%arg0: i32) -> (i32, i32) {
    %c0_i32 = arith.constant 0 : i32
    %c0_i32_0 = arith.constant 0 : i32
    %c0_i32_1 = arith.constant 0 : i32
    return %c0_i32, %c0_i32_0 : i32, i32
  }
  func.func @transform_3(%arg0: i32) -> (i32, i32) {
    %c0_i32 = arith.constant 0 : i32
    %c0_i32_0 = arith.constant 0 : i32
    return %arg0, %c0_i32 : i32, i32
  }
}

</mosaic_0001>

<bundles_post_ra>
// kernel: dct_adapter_forward.1
= control target key start
LH: loop header
LB: loop body
LE: loop exit
PB: predicated region body
PF: predicated region fallthrough
CT: control target
= control target key end

     0   :  { %8 = vsyncpa [#allocation3], 0  ;;  %s635_s0 = inlined_call_operand.hbm [shape: f32[16,128], index: 0, kind: input, shape index: {}]   ;;  %s636_s1 = inlined_call_operand.hbm [shape: f32[128,128], index: 1, kind: input, shape index: {}]   ;;  %s637_s2 = inlined_call_operand.hbm [shape: f32[128,128], index: 2, kind: input, shape index: {}]   ;;  %s638_s3 = inlined_call_operand.hbm [shape: f32[16,128], index: 3, kind: output, shape index: {}]  }
   0x1   :  { %9 = vsyncpa [#allocation6], 0 }
   0x2   :  { %10 = vsyncpa [#allocation4], 0  ;;  %s538_s12 = smov [#allocation5]   ;;  %s539_s14 = smov [#allocation2]  }
   0x3   :  { %s28_s13 = sshll.u32 %s538_s12, 4  ;;  %s16_s15 = sshll.u32 %s539_s14, 4  ;;  %s29_s13 = int_to_ptr.vmem [resolvable:$true] %s28_s13  ;;  %s564_s15 = int_to_ptr.vmem [resolvable:$true] %s16_s15 }
   0x4   :  { %s444_s18 = scalar_lea.hbm %s636_s1, 2048 }
   0x5   :  { %p445_p0 = scmp.ne.s32.totalorder %s636_s1, %s444_s18  ;;  %p448_p1 = scmp.lt.u32.totalorder %s444_s18, %s636_s1 }
   0x7   :  { %p450_p2 = pnand %p448_p1, %p445_p0 }
   0x9   :  { %453 = shalt.err (!%p450_p2)
}
   0xa   :  { %s454_s23 = scalar_lea.vmem %s29_s13, 2048  ;;  %p459_p4 = scmp.lt.s32.totalorder %s29_s13, %s29_s13 }
   0xb   :  { %p455_p3 = scmp.ne.s32.totalorder %s29_s13, %s454_s23  ;;  %p460_p5 = scmp.lt.s32.totalorder %s454_s23, %s454_s23 }
   0xd   :  { %p461_p6 = por %p460_p5, %p459_p4 }
   0xf   :  { %p462_p7 = pnand %p461_p6, %p455_p3 }
  0x11   :  { %465 = shalt.err (!%p462_p7)
}
  0x12   :  { %s540_s24 = smov 128   ;;  %s541_s25 = smov 8  }
  0x13   :  { %34 = dma.hbm_to_vmem [thread:$0]  %s636_s1, 2048, %s29_s13, [#allocation6], %s540_s24, %s540_s24, %s541_s25  }
  0x14   :  { %s466_s30 = scalar_lea.hbm %s635_s0, 256 }
  0x15   :  { %p467_p8 = scmp.ne.s32.totalorder %s635_s0, %s466_s30  ;;  %p470_p9 = scmp.lt.u32.totalorder %s466_s30, %s635_s0 }
  0x17   :  { %p472_p10 = pnand %p470_p9, %p467_p8 }
  0x19   :  { %475 = shalt.err (!%p472_p10)
}
  0x1a   :  { %s476_s8 = scalar_lea.vmem %s564_s15, 256  ;;  %p481_p12 = scmp.lt.s32.totalorder %s564_s15, %s564_s15 }
  0x1b   :  { %p477_p11 = scmp.ne.s32.totalorder %s564_s15, %s476_s8  ;;  %p482_p13 = scmp.lt.s32.totalorder %s476_s8, %s476_s8 }
  0x1d   :  { %p483_p0 = por %p482_p13, %p481_p12 }
  0x1f   :  { %p484_p1 = pnand %p483_p0, %p477_p11 }
  0x21   :  { %487 = shalt.err (!%p484_p1)
}
  0x22   :  { %22 = dma.hbm_to_vmem [thread:$0]  %s635_s0, 256, %s564_s15, [#allocation3], %s540_s24, %s540_s24, %s541_s25  }
  0x23   :  { %s542_s10 = smov [#allocation7]   ;;  %s488_s14 = scalar_lea.hbm %s637_s2, 2048 }
  0x24   :  { %s40_s11 = sshll.u32 %s542_s10, 4  ;;  %p489_p2 = scmp.ne.s32.totalorder %s637_s2, %s488_s14  ;;  %s41_s11 = int_to_ptr.vmem [resolvable:$true] %s40_s11 }
  0x25   :  { %p492_p3 = scmp.lt.u32.totalorder %s488_s14, %s637_s2 }
  0x27   :  { %p494_p4 = pnand %p492_p3, %p489_p2 }
  0x29   :  { %497 = shalt.err (!%p494_p4)
}
  0x2a   :  { %s498_s20 = scalar_lea.vmem %s41_s11, 2048  ;;  %p503_p6 = scmp.lt.s32.totalorder %s41_s11, %s41_s11 }
  0x2b   :  { %p499_p5 = scmp.ne.s32.totalorder %s41_s11, %s498_s20  ;;  %p504_p7 = scmp.lt.s32.totalorder %s498_s20, %s498_s20 }
  0x2d   :  { %p505_p8 = por %p504_p7, %p503_p6 }
  0x2f   :  { %p506_p9 = pnand %p505_p8, %p499_p5 }
  0x31   :  { %509 = shalt.err (!%p506_p9)
}
  0x32   :  { %46 = dma.hbm_to_vmem [thread:$0]  %s637_s2, 2048, %s41_s11, [#allocation6], %s540_s24, %s540_s24, %s541_s25  }
  0x33   :  { %532 = dma.done.wait [#allocation3], 256  }
  0x34   :  { %533 = vsyncadd [#allocation3], 4294967040 }
  0x35   :  { %534 = dma.done.wait [#allocation6], 4096  }
  0x36   :  { %535 = vsyncadd [#allocation6], 4294963200  ;;  %v58_v0 = vld [vmem:[#allocation5] sm:$0xff]  ;;  %v59_v1 = vld [vmem:[#allocation5 + $0x8] sm:$0xff]  ;;  %s543_s2 = smov [#allocation8]  }
  0x37   :  { %v60_v2 = vld [vmem:[#allocation5 + $0x10] sm:$0xff]  ;;  %v374_v3 = vpack.c.bf16 %v59_v1, %v58_v0  ;;  %v61_v4 = vld [vmem:[#allocation5 + $0x18] sm:$0xff]  ;;  %v62_v6 = vld [vmem:[#allocation5 + $0x20] sm:$0xff]  ;;  %s255_s21 = sshll.u32 %s543_s2, 4  ;;  %s256_s21 = int_to_ptr.vmem [resolvable:$true] %s255_s21 }
  0x38   :  { %v378_v5 = vpack.c.bf16 %v61_v4, %v60_v2  ;;  %v63_v7 = vld [vmem:[#allocation5 + $0x28] sm:$0xff]  ;;  %v64_v9 = vld [vmem:[#allocation5 + $0x30] sm:$0xff]  ;;  %v65_v10 = vld [vmem:[#allocation5 + $0x38] sm:$0xff]  ;;  %s510_s22 = scalar_lea.vmem %s256_s21, 256  ;;  %p515_p11 = scmp.lt.s32.totalorder %s256_s21, %s256_s21 }
  0x39   :  { %375 = vmatprep.subr.bf16.mxu0 %v374_v3  ;;  %v382_v8 = vpack.c.bf16 %v63_v7, %v62_v6  ;;  %v616_v11 = vld [vmem:[#allocation2] sm:$0xff]  ;;  %v155_v12 = vld [vmem:[#allocation7] sm:$0xff]  ;;  %v156_v13 = vld [vmem:[#allocation7 + $0x8] sm:$0xff]  ;;  %v386_v20 = vpack.c.bf16 %v65_v10, %v64_v9  ;;  %p511_p10 = scmp.ne.s32.totalorder %s256_s21, %s510_s22  ;;  %p516_p12 = scmp.lt.s32.totalorder %s510_s22, %s510_s22 }
  0x3a   :  { %377 = vmatpush3.bf16.msra.mxu0 %v374_v3  ;;  %336 = vmatprep.mubr.f32.mxu0 %v616_v11  ;;  %v157_v14 = vld [vmem:[#allocation7 + $0x10] sm:$0xff]  ;;  %v406_v15 = vpack.c.bf16 %v156_v13, %v155_v12  ;;  %v158_v16 = vld [vmem:[#allocation7 + $0x18] sm:$0xff]  ;;  %v159_v18 = vld [vmem:[#allocation7 + $0x20] sm:$0xff] }
  0x3b   :  { %379 = vmatprep.subr.bf16.mxu0 %v378_v5  ;;  %v410_v17 = vpack.c.bf16 %v158_v16, %v157_v14  ;;  %v160_v19 = vld [vmem:[#allocation7 + $0x28] sm:$0xff]  ;;  %v66_v21 = vld [vmem:[#allocation5 + $0x40] sm:$0xff]  ;;  %v161_v24 = vld [vmem:[#allocation7 + $0x30] sm:$0xff]  ;;  %p517_p13 = por %p516_p12, %p515_p11 }
  0x3c   :  { %407 = vmatprep.subr.bf16.mxu1 %v406_v15  ;;  %v67_v22 = vld [vmem:[#allocation5 + $0x48] sm:$0xff]  ;;  %v414_v23 = vpack.c.bf16 %v160_v19, %v159_v18  ;;  %v162_v25 = vld [vmem:[#allocation7 + $0x38] sm:$0xff]  ;;  %v68_v27 = vld [vmem:[#allocation5 + $0x50] sm:$0xff] }
  0x3d   :  { %409 = vmatpush3.bf16.msra.mxu1 %v406_v15  ;;  %v390_v26 = vpack.c.bf16 %v67_v22, %v66_v21  ;;  %v69_v28 = vld [vmem:[#allocation5 + $0x58] sm:$0xff]  ;;  %v418_v29 = vpack.c.bf16 %v162_v25, %v161_v24  ;;  %v163_v30 = vld [vmem:[#allocation7 + $0x40] sm:$0xff]  ;;  %v164_v31 = vld [vmem:[#allocation7 + $0x48] sm:$0xff]  ;;  %p518_p0 = pnand %p517_p13, %p511_p10 }
  0x3e   :  { %381 = vmatpush3.bf16.msra.mxu0 %v378_v5  ;;  %411 = vmatprep.subr.bf16.mxu1 %v410_v17  ;;  %v394_v32 = vpack.c.bf16 %v69_v28, %v68_v27  ;;  %v70_v33 = vld [vmem:[#allocation5 + $0x60] sm:$0xff]  ;;  %v71_v34 = vld [vmem:[#allocation5 + $0x68] sm:$0xff]  ;;  %v422_v35 = vpack.c.bf16 %v164_v31, %v163_v30  ;;  %v165_v36 = vld [vmem:[#allocation7 + $0x50] sm:$0xff] }
  0x3f   :  { %383 = vmatprep.subr.bf16.mxu0 %v382_v8  ;;  %v166_v37 = vld [vmem:[#allocation7 + $0x58] sm:$0xff]  ;;  %v398_v38 = vpack.c.bf16 %v71_v34, %v70_v33  ;;  %v72_v39 = vld [vmem:[#allocation5 + $0x70] sm:$0xff]  ;;  %v167_v42 = vld [vmem:[#allocation7 + $0x60] sm:$0xff] }
  0x40   :  { %v73_v40 = vld [vmem:[#allocation5 + $0x78] sm:$0xff]  ;;  %v426_v41 = vpack.c.bf16 %v166_v37, %v165_v36  ;;  %v168_v43 = vld [vmem:[#allocation7 + $0x68] sm:$0xff]  ;;  %v169_v47 = vld [vmem:[#allocation7 + $0x70] sm:$0xff] }
  0x41   :  { %413 = vmatpush3.bf16.msra.mxu1 %v410_v17  ;;  %v402_v44 = vpack.c.bf16 %v73_v40, %v72_v39  ;;  %v430_v45 = vpack.c.bf16 %v168_v43, %v167_v42  ;;  %v57_v46 = vld [vmem:[#allocation2 + $0x8] sm:$0xff] }
  0x42   :  { %385 = vmatpush3.bf16.msra.mxu0 %v382_v8  ;;  %415 = vmatprep.subr.bf16.mxu1 %v414_v23  ;;  %v170_v48 = vld [vmem:[#allocation7 + $0x78] sm:$0xff] }
  0x43   :  { %387 = vmatprep.subr.bf16.mxu0 %v386_v20  ;;  %v434_v49 = vpack.c.bf16 %v170_v48, %v169_v47 }
  0x45   :  { %417 = vmatpush3.bf16.msra.mxu1 %v414_v23 }
  0x46   :  { %389 = vmatpush3.bf16.msra.mxu0 %v386_v20  ;;  %419 = vmatprep.subr.bf16.mxu1 %v418_v29 }
  0x47   :  { %391 = vmatprep.subr.bf16.mxu0 %v390_v26 }
  0x49   :  { %421 = vmatpush3.bf16.msra.mxu1 %v418_v29 }
  0x4a   :  { %393 = vmatpush3.bf16.msra.mxu0 %v390_v26  ;;  %423 = vmatprep.subr.bf16.mxu1 %v422_v35 }
  0x4b   :  { %395 = vmatprep.subr.bf16.mxu0 %v394_v32 }
  0x4d   :  { %425 = vmatpush3.bf16.msra.mxu1 %v422_v35 }
  0x4e   :  { %397 = vmatpush3.bf16.msra.mxu0 %v394_v32  ;;  %427 = vmatprep.subr.bf16.mxu1 %v426_v41 }
  0x4f   :  { %399 = vmatprep.subr.bf16.mxu0 %v398_v38 }
  0x51   :  { %429 = vmatpush3.bf16.msra.mxu1 %v426_v41 }
  0x52   :  { %401 = vmatpush3.bf16.msra.mxu0 %v398_v38  ;;  %431 = vmatprep.subr.bf16.mxu1 %v430_v45 }
  0x53   :  { %403 = vmatprep.subr.bf16.mxu0 %v402_v44 }
  0x55   :  { %433 = vmatpush3.bf16.msra.mxu1 %v430_v45 }
  0x56   :  { %405 = vmatpush3.bf16.msra.mxu0 %v402_v44  ;;  %435 = vmatprep.subr.bf16.mxu1 %v434_v49 }
  0x59   :  { %337 = vmatmul.mubr.f32.vlgmr.msra.gmra.mrb[0].mxu0 %v57_v46  ;;  %437 = vmatpush3.bf16.msra.mxu1 %v434_v49 }
 0x12c   :  { %v338_v50 = vpop.f32.mrb[0].mxu0 }
 0x12d   :  { %v152_v51 = vmul.f32 0.01, %v338_v50  ;;  %v140_v52 = vpop.f32.mrb[1].mxu0  ;;  %vm150_vm0 = vcmp.ge.f32.partialorder %v338_v50, 0.0 }
 0x12e   :  { %vm149_vm1 = vcmp.ge.f32.partialorder %v140_v52, 0.0  ;;  %v151_v53 = vmul.f32 0.01, %v140_v52 }
 0x12f   :  { %v154_v55 = vsel %vm150_vm0, %v338_v50, %v152_v51 }
 0x130   :  { %v153_v54 = vsel %vm149_vm1, %v140_v52, %v151_v53 }
 0x131   :  { %371 = vmatprep.mubr.f32.mxu1 %v153_v54 }
 0x132   :  { %372 = vmatmul.mubr.f32.vlgmr.msra.gmra.mrb[0].mxu1 %v154_v55 }
 0x205   :  { %v373_v56 = vpop.f32.mrb[0].mxu1 }
 0x206   :  { %v247_v57 = vadd.f32 %v373_v56, %v57_v46  ;;  %v237_v58 = vpop.f32.mrb[1].mxu1 }
 0x207   :  { %v246_v59 = vadd.f32 %v237_v58, %v616_v11 }
 0x208   :  { %249 = vst [vmem:[#allocation8 + $0x8] sm:$0xff] %v247_v57 }
 0x209   :  { %248 = vst [vmem:[#allocation8] sm:$0xff] %v246_v59 }
 0x20a   :  { %521 = shalt.err (!%p518_p0)
}
 0x20b   :  { %s522_s27 = scalar_lea.hbm %s638_s3, 256 }
 0x20c   :  { %p523_p1 = scmp.ne.s32.totalorder %s638_s3, %s522_s27  ;;  %p526_p2 = scmp.lt.u32.totalorder %s522_s27, %s638_s3 }
 0x20e   :  { %p528_p3 = pnand %p526_p2, %p523_p1 }
 0x210   :  { %531 = shalt.err (!%p528_p3)
}
 0x211   :  { %261 = dma.vmem_to_hbm [thread:$0]  %s256_s21, 256, %s638_s3, [#allocation4], %s540_s24, %s540_s24, %s541_s25  }
 0x212   :  { %536 = dma.done.wait [#allocation4], 256  }
 0x213   :  { %537 = vsyncadd [#allocation4], 4294967040 }
 0x214   :  { %265 = vsyncpa [#allocation3], 1 }
 0x215   :  { %266 = vsyncpa [#allocation6], 1 }
 0x216   :  { %267 = vsyncpa [#allocation4], 1 }

</bundles_post_ra>
